<compile_context>
chip_gen: v6e
topology: v6e:2x2x1
jax: 0.10.0
libtpu: 0.0.40
codegen_flags: <defaults>
</compile_context>

<pallas_src>
import functools

import jax
import jax.numpy as jnp
from jax.experimental import pallas as pl
from jax.experimental.pallas import tpu as pltpu


def _round_up(x, m):
    return ((x + m - 1) // m) * m


# ---------------------------------------------------------------------------
# Pallas kernels
# ---------------------------------------------------------------------------

def _gemm_epilogue_kernel(a_ref, b_ref, scale_ref, shift_ref, o_ref, *, relu):
    # (tm, K)bf16 @ (K, Np)bf16 -> f32, fused per-column scale/shift (+ReLU)
    acc = jnp.dot(a_ref[...], b_ref[...], preferred_element_type=jnp.float32)
    acc = acc * scale_ref[...] + shift_ref[...]
    if relu:
        acc = jnp.maximum(acc, 0.0)
    o_ref[...] = acc


def _conv_gap_kernel(a_ref, b_ref, scale_ref, shift_ref, o_ref, acc_ref,
                     *, n_valid):
    # Fused gap-conv GEMM + global average pool.
    #   grid = (batch, spatial_tiles); a_ref: (1, ts, K); b_ref: (K, Np)
    # Accumulate raw conv row-sums in VMEM (padded rows are all-zero patches
    # -> contribute exactly 0); apply BN affine + 1/HW on the last step.
    s = pl.program_id(1)

    @pl.when(s == 0)
    def _():
        acc_ref[...] = jnp.zeros_like(acc_ref)

    part = jnp.dot(a_ref[0], b_ref[...], preferred_element_type=jnp.float32)
    acc_ref[...] += jnp.sum(part, axis=0, keepdims=True)

    @pl.when(s == pl.num_programs(1) - 1)
    def _():
        pooled = acc_ref[...] * (1.0 / n_valid)
        o_ref[0] = pooled * scale_ref[...] + shift_ref[...]


# ---------------------------------------------------------------------------
# Pallas wrappers
# ---------------------------------------------------------------------------

def gemm_scale_shift(a, b, scale, shift, *, relu=False):
    """(M,K) @ (K,N) with fused per-column scale/shift (+ optional ReLU).

    * operands cast to bf16 (f32 accumulation on the MXU)
    * N padded to a multiple of 128 (lane-dense unmasked stores)
    * M tiled by 256 / 128, or a single whole-M block when M is small
    """
    M, K = a.shape
    K2, N = b.shape
    assert K == K2
    Np = _round_up(N, 128)

    Mp0 = _round_up(M, 16)          # bf16 sublane-pack friendly
    if Mp0 >= 512:
        tm = 256
    elif Mp0 >= 128:
        tm = 128
    else:
        tm = Mp0
    Mp = _round_up(M, tm)

    a = a.astype(jnp.bfloat16)
    b = b.astype(jnp.bfloat16)
    scale = scale.astype(jnp.float32)
    shift = shift.astype(jnp.float32)
    if Mp != M:
        a = jnp.pad(a, ((0, Mp - M), (0, 0)))
    if Np != N:
        b = jnp.pad(b, ((0, 0), (0, Np - N)))
        scale = jnp.pad(scale, ((0, 0), (0, Np - N)))
        shift = jnp.pad(shift, ((0, 0), (0, Np - N)))

    cost = pl.CostEstimate(
        flops=2 * Mp * K * Np,
        transcendentals=0,
        bytes_accessed=(Mp * K + K * Np) * 2 + (Mp * Np + 2 * Np) * 4)

    out = pl.pallas_call(
        functools.partial(_gemm_epilogue_kernel, relu=relu),
        out_shape=jax.ShapeDtypeStruct((Mp, Np), jnp.float32),
        grid=(Mp // tm,),
        in_specs=[
            pl.BlockSpec((tm, K), lambda i: (i, 0)),
            pl.BlockSpec((K, Np), lambda i: (0, 0)),
            pl.BlockSpec((1, Np), lambda i: (0, 0)),
            pl.BlockSpec((1, Np), lambda i: (0, 0)),
        ],
        out_specs=pl.BlockSpec((tm, Np), lambda i: (i, 0)),
        compiler_params=pltpu.CompilerParams(
            dimension_semantics=("parallel",)),
        cost_estimate=cost,
    )(a, b, scale, shift)
    return out[:M, :N]


# ---------------------------------------------------------------------------
# Conv lowering (im2col glue + Pallas GEMM)
# ---------------------------------------------------------------------------

def _im2col(x_nhwc, kh, kw, stride, pad):
    """NHWC -> (N*Ho*Wo, kh*kw*Cin) patches, K ordered as (kh, kw, Cin)."""
    N, H, W, C = x_nhwc.shape
    xp = jnp.pad(x_nhwc, ((0, 0), (pad, pad), (pad, pad), (0, 0)))
    Ho = (H + 2 * pad - kh) // stride + 1
    Wo = (W + 2 * pad - kw) // stride + 1
    cols = []
    for i in range(kh):
        for j in range(kw):
            cols.append(
                xp[:, i:i + stride * Ho:stride, j:j + stride * Wo:stride, :])
    patches = jnp.concatenate(cols, axis=-1)          # (N, Ho, Wo, kh*kw*C)
    return patches.reshape(N * Ho * Wo, kh * kw * C), Ho, Wo


def _weight_to_mat(w_oihw):
    Cout, Cin, kh, kw = w_oihw.shape
    # (kh, kw, Cin, Cout) flattening matches the im2col K ordering above.
    return jnp.transpose(w_oihw, (2, 3, 1, 0)).reshape(kh * kw * Cin, Cout)


def conv_bn_act(x_nhwc, w_oihw, bn_scale, bn_shift, *, stride, pad, relu):
    """Conv2d(bias=False) + BatchNorm + (ReLU), fused into one Pallas GEMM."""
    Cout, Cin, kh, kw = w_oihw.shape
    patches, Ho, Wo = _im2col(x_nhwc.astype(jnp.bfloat16), kh, kw, stride, pad)
    w_mat = _weight_to_mat(w_oihw)
    out = gemm_scale_shift(
        patches, w_mat,
        bn_scale.reshape(1, Cout), bn_shift.reshape(1, Cout), relu=relu)
    N = x_nhwc.shape[0]
    return out.reshape(N, Ho, Wo, Cout)


def conv_bn_gap(x_nhwc, w_oihw, bn_scale, bn_shift, *, stride, pad):
    """Conv2d + BN + AdaptiveAvgPool2d(1), fused into ONE Pallas kernel.

    Returns (B, Cout).  The full conv activation never touches HBM.
    """
    Cout, Cin, kh, kw = w_oihw.shape
    B = x_nhwc.shape[0]
    patches, Ho, Wo = _im2col(x_nhwc.astype(jnp.bfloat16), kh, kw, stride, pad)
    K = kh * kw * Cin
    S = Ho * Wo

    # spatial tile (multiple of 16 for bf16 sublane packing)
    if S >= 256:
        ts = 256
    else:
        ts = _round_up(S, 16)
    S_pad = _round_up(S, ts)

    p = patches.reshape(B, S, K)
    if S_pad != S:
        p = jnp.pad(p, ((0, 0), (0, S_pad - S), (0, 0)))

    Np = _round_up(Cout, 128)
    w_mat = _weight_to_mat(w_oihw).astype(jnp.bfloat16)
    scale = bn_scale.reshape(1, Cout).astype(jnp.float32)
    shift = bn_shift.reshape(1, Cout).astype(jnp.float32)
    if Np != Cout:
        w_mat = jnp.pad(w_mat, ((0, 0), (0, Np - Cout)))
        scale = jnp.pad(scale, ((0, 0), (0, Np - Cout)))
        shift = jnp.pad(shift, ((0, 0), (0, Np - Cout)))

    cost = pl.CostEstimate(
        flops=2 * B * S_pad * K * Np,
        transcendentals=0,
        bytes_accessed=(B * S_pad * K + K * Np) * 2 + (B * Np + 2 * Np) * 4)

    out = pl.pallas_call(
        functools.partial(_conv_gap_kernel, n_valid=S),
        out_shape=jax.ShapeDtypeStruct((B, 1, Np), jnp.float32),
        grid=(B, S_pad // ts),
        in_specs=[
            pl.BlockSpec((1, ts, K), lambda b, s: (b, s, 0)),
            pl.BlockSpec((K, Np), lambda b, s: (0, 0)),
            pl.BlockSpec((1, Np), lambda b, s: (0, 0)),
            pl.BlockSpec((1, Np), lambda b, s: (0, 0)),
        ],
        out_specs=pl.BlockSpec((1, 1, Np), lambda b, s: (b, 0, 0)),
        scratch_shapes=[pltpu.VMEM((1, Np), jnp.float32)],
        compiler_params=pltpu.CompilerParams(
            dimension_semantics=("parallel", "arbitrary")),
        cost_estimate=cost,
    )(p, w_mat, scale, shift)
    return out.reshape(B, Np)[:, :Cout]


def _bn_affine(gamma, beta, mean, var, eps=1e-5):
    scale = gamma / jnp.sqrt(var + eps)
    shift = beta - mean * scale
    return scale, shift


# ---------------------------------------------------------------------------
# AugmentCNN
# ---------------------------------------------------------------------------

class AugmentCNNPallas:
    def __init__(self, key, input_size, C_in, C, n_classes, n_layers=0):
        assert n_layers == 0, (
            "TODO(synk): AugmentCell/genotype not provided; only n_layers=0")
        self.C_in = C_in
        self.n_classes = n_classes
        C_cur = 32
        C_p = C_cur  # with zero cells, C_p stays at the stem width

        k1, k2, k3, k4 = jax.random.split(key, 4)

        def kaiming(k, shape):
            fan_in = shape[1] * shape[2] * shape[3]
            return (jnp.sqrt(2.0 / fan_in)
                    * jax.random.normal(k, shape, jnp.float32))

        # --- stem ---
        # bn0 (per-input-channel affine) is folded into conv1's weights and
        # bn1's shift.  Exact here because bn0's shift is 0 under the
        # PyTorch-default running stats (mean=0, var=1, gamma=1, beta=0); with
        # non-zero shift the zero-padded border of Conv2d would differ.
        bn0_scale, bn0_shift = _bn_affine(jnp.ones(C_in), jnp.zeros(C_in),
                                          jnp.zeros(C_in), jnp.ones(C_in))
        w1 = kaiming(k1, (C_cur, C_in, 5, 5))
        self.w_conv1 = w1 * bn0_scale.reshape(1, C_in, 1, 1)
        bias0 = jnp.einsum('oihw,i->o', w1, bn0_shift)
        s1, t1 = _bn_affine(jnp.ones(C_cur), jnp.zeros(C_cur),
                            jnp.zeros(C_cur), jnp.ones(C_cur))
        self.bn1 = (s1, t1 + bias0 * s1)

        self.w_conv2 = kaiming(k2, (C_cur, C_cur, 3, 3))
        self.bn2 = _bn_affine(jnp.ones(C_cur), jnp.zeros(C_cur),
                              jnp.zeros(C_cur), jnp.ones(C_cur))

        # --- gap head ---
        self.w_conv3 = kaiming(k3, (512, C_p, 3, 3))
        self.bn3 = _bn_affine(jnp.ones(512), jnp.zeros(512),
                              jnp.zeros(512), jnp.ones(512))

        # --- linear (xavier normal weight, zero bias) ---
        k4a, _ = jax.random.split(k4)
        std = jnp.sqrt(2.0 / (512 + n_classes))
        self.w_linear = std * jax.random.normal(
            k4a, (n_classes, 512), jnp.float32)
        self.b_linear = jnp.zeros((n_classes,), jnp.float32)

    def __call__(self, x_nchw):
        x = jnp.transpose(x_nchw, (0, 2, 3, 1)).astype(jnp.float32)  # -> NHWC

        # stem: (BN folded) Conv5x5/s2 + BN + ReLU -> Conv3x3/s2 + BN + ReLU
        x = conv_bn_act(x, self.w_conv1, *self.bn1, stride=2, pad=2, relu=True)
        x = conv_bn_act(x, self.w_conv2, *self.bn2, stride=2, pad=1, relu=True)

        # TODO(synk): AugmentCell loop omitted (n_layers == 0, empty ModuleList)
        s1_feat = x

        # gap: Conv3x3/s2 + BN + AdaptiveAvgPool2d(1), single fused kernel
        y = conv_bn_gap(s1_feat, self.w_conv3, *self.bn3, stride=2, pad=1)

        # linear (Pallas GEMM, bias fused via shift, scale=1)
        logits = gemm_scale_shift(
            y, self.w_linear.T,
            jnp.ones((1, self.n_classes), jnp.float32),
            self.b_linear.reshape(1, self.n_classes), relu=False)

        # matches torch.squeeze semantics (squeezes any size-1 dims)
        return jnp.squeeze(logits)


# ---------------------------------------------------------------------------
# main
# ---------------------------------------------------------------------------

if __name__ == "__main__":
    key = jax.random.PRNGKey(0)
    k_model, k_x = jax.random.split(key)

    batch, C_in, input_size, n_classes = 2, 4, 16, 10
    model = AugmentCNNPallas(k_model, input_size=input_size, C_in=C_in,
                             C=32, n_classes=n_classes, n_layers=0)

    x = jax.random.normal(k_x, (batch, C_in, input_size, input_size),
                          jnp.float32)

    logits = model(x)
    jax.block_until_ready(logits)
    assert logits.shape == (batch, n_classes)
    print("KERNEL_OK")
</pallas_src>

<mosaic_0001>
module attributes {stable_mosaic.version = 11 : i64} {
  func.func @_gemm_epilogue_kernel(%arg0: i32, %arg1: memref<128x100xbf16, #tpu.memory_space<vmem>>, %arg2: memref<100x128xbf16, #tpu.memory_space<vmem>>, %arg3: memref<1x128xf32, #tpu.memory_space<vmem>>, %arg4: memref<1x128xf32, #tpu.memory_space<vmem>>, %arg5: memref<128x128xf32, #tpu.memory_space<vmem>>) attributes {dimension_semantics = [#tpu.dimension_semantics<parallel>], iteration_bounds = array<i64: 1>, scalar_prefetch = 0 : i64, scratch_operands = 0 : i64, tpu.core_type = #tpu.core_type<tc>, window_params = [{transform_indices = @transform_0, window_bounds = array<i64: 128, 100>}, {pipeline_mode = #tpu.pipeline_mode<synchronous>, transform_indices = @transform_1, window_bounds = array<i64: 100, 128>}, {pipeline_mode = #tpu.pipeline_mode<synchronous>, transform_indices = @transform_2, window_bounds = array<i64: 1, 128>}, {pipeline_mode = #tpu.pipeline_mode<synchronous>, transform_indices = @transform_3, window_bounds = array<i64: 1, 128>}, {transform_indices = @transform_4, window_bounds = array<i64: 128, 128>}]} {
    %c0 = arith.constant 0 : index
    %c0_0 = arith.constant 0 : index
    %0 = vector.load %arg1[%c0, %c0_0] : memref<128x100xbf16, #tpu.memory_space<vmem>>, vector<128x100xbf16>
    %c0_1 = arith.constant 0 : index
    %c0_2 = arith.constant 0 : index
    %1 = vector.load %arg2[%c0_1, %c0_2] : memref<100x128xbf16, #tpu.memory_space<vmem>>, vector<100x128xbf16>
    %cst = arith.constant dense<0.000000e+00> : vector<128x128xf32>
    %2 = tpu.matmul %0, %1, %cst {dimension_numbers = #tpu.dot_dimension_numbers<[1], [0], [0], [1], [0, 0, 1, 1], [], []>} : vector<128x100xbf16>, vector<100x128xbf16>, vector<128x128xf32> -> vector<128x128xf32>
    %c0_3 = arith.constant 0 : index
    %c0_4 = arith.constant 0 : index
    %3 = vector.load %arg3[%c0_3, %c0_4] : memref<1x128xf32, #tpu.memory_space<vmem>>, vector<1x128xf32>
    %4 = vector.broadcast %3 : vector<1x128xf32> to vector<128x128xf32>
    %5 = arith.mulf %2, %4 : vector<128x128xf32>
    %c0_5 = arith.constant 0 : index
    %c0_6 = arith.constant 0 : index
    %6 = vector.load %arg4[%c0_5, %c0_6] : memref<1x128xf32, #tpu.memory_space<vmem>>, vector<1x128xf32>
    %7 = vector.broadcast %6 : vector<1x128xf32> to vector<128x128xf32>
    %8 = arith.addf %5, %7 : vector<128x128xf32>
    %cst_7 = arith.constant 0.000000e+00 : f32
    %9 = vector.broadcast %cst_7 : f32 to vector<128x128xf32>
    %10 = arith.maximumf %8, %9 : vector<128x128xf32>
    %c0_8 = arith.constant 0 : index
    %c0_9 = arith.constant 0 : index
    %11 = vector.load %arg5[%c0_8, %c0_9] : memref<128x128xf32, #tpu.memory_space<vmem>>, vector<128x128xf32>
    tpu.vector_store %arg5[%c0_8, %c0_9], %10 {strides = array<i32>} : memref<128x128xf32, #tpu.memory_space<vmem>>, vector<128x128xf32>,
    return
  }
  func.func @transform_0(%arg0: i32) -> (i32, i32) {
    %c0_i32 = arith.constant 0 : i32
    %c0_i32_0 = arith.constant 0 : i32
    return %arg0, %c0_i32 : i32, i32
  }
  func.func @transform_1(%arg0: i32) -> (i32, i32) {
    %c0_i32 = arith.constant 0 : i32
    %c0_i32_0 = arith.constant 0 : i32
    %c0_i32_1 = arith.constant 0 : i32
    return %c0_i32, %c0_i32_0 : i32, i32
  }
  func.func @transform_2(%arg0: i32) -> (i32, i32) {
    %c0_i32 = arith.constant 0 : i32
    %c0_i32_0 = arith.constant 0 : i32
    %c0_i32_1 = arith.constant 0 : i32
    return %c0_i32, %c0_i32_0 : i32, i32
  }
  func.func @transform_3(%arg0: i32) -> (i32, i32) {
    %c0_i32 = arith.constant 0 : i32
    %c0_i32_0 = arith.constant 0 : i32
    %c0_i32_1 = arith.constant 0 : i32
    return %c0_i32, %c0_i32_0 : i32, i32
  }
  func.func @transform_4(%arg0: i32) -> (i32, i32) {
    %c0_i32 = arith.constant 0 : i32
    %c0_i32_0 = arith.constant 0 : i32
    return %arg0, %c0_i32 : i32, i32
  }
}

</mosaic_0001>

<bundles_post_ra>
// kernel: tpu_custom_call.1
= control target key start
LH: loop header
LB: loop body
LE: loop exit
PB: predicated region body
PF: predicated region fallthrough
CT: control target
= control target key end

     0   :  { %vm152_vm0 = vcmask 1041408   ;;  %vm127_vm1 = vcmask 818176   ;;  %s599_s0 = inlined_call_operand.vmem [shape: bf16[128,100], index: 0, kind: input, shape index: {}]   ;;  %s600_s1 = inlined_call_operand.vmem [shape: bf16[100,128], index: 1, kind: input, shape index: {}]   ;;  %s601_s2 = inlined_call_operand.vmem [shape: f32[1,128], index: 2, kind: input, shape index: {}]   ;;  %s602_s3 = inlined_call_operand.vmem [shape: f32[1,128], index: 3, kind: input, shape index: {}]   ;;  %s603_s4 = inlined_call_operand.hbm [shape: f32[128,128], index: 4, kind: output, shape index: {}]  }
   0x1   :  { %v436_v0 = vld [vmem:[%s600_s1 + $0x30] ss:$0 sps:$4 sm:$0x33]   ;;  %v437_v1 = vld [vmem:[%s600_s1 + $0x28] sm:$0xff]   ;;  %v438_v3 = vld [vmem:[%s600_s1 + $0x20] sm:$0xff]  }
   0x2   :  { %431 = vmatprep.subr.msk.bf16.mxu0 %vm152_vm0, %v436_v0  ;;  %432 = vmatprep.subr.msk.bf16.mxu1 %vm152_vm0, %v436_v0  ;;  %v154_v2 = vsel %vm152_vm0, %v436_v0, 0  ;;  %v439_v4 = vld [vmem:[%s600_s1 + $0x18] sm:$0xff]   ;;  %v443_v5 = vld [vmem:[%s599_s0] sm:$0xff]   ;;  %v440_v7 = vld [vmem:[%s600_s1 + $0x10] sm:$0xff]  }
   0x3   :  { %388 = vmatpush3.bf16.msra.mxu0 %v154_v2  ;;  %424 = vmatpush3.bf16.msra.mxu1 %v154_v2  ;;  %v444_v6 = vld [vmem:[%s599_s0 + $0x20] sm:$0xff]  }
   0x4   :  { %389 = vmatprep.subr.bf16.mxu0 %v437_v1  ;;  %418 = vmatprep.subr.bf16.mxu1 %v437_v1 }
   0x5   :  { %401 = vmatprep.mubr.msk.bf16.mxu0 %vm127_vm1, %v443_v5  ;;  %409 = vmatprep.mubr.msk.bf16.mxu1 %vm127_vm1, %v444_v6 }
   0x7   :  { %390 = vmatpush3.bf16.msra.mxu0 %v437_v1  ;;  %425 = vmatpush3.bf16.msra.mxu1 %v437_v1 }
   0x8   :  { %391 = vmatprep.subr.bf16.mxu0 %v438_v3  ;;  %419 = vmatprep.subr.bf16.mxu1 %v438_v3 }
   0xb   :  { %392 = vmatpush3.bf16.msra.mxu0 %v438_v3  ;;  %426 = vmatpush3.bf16.msra.mxu1 %v438_v3 }
   0xc   :  { %393 = vmatprep.subr.bf16.mxu0 %v439_v4  ;;  %420 = vmatprep.subr.bf16.mxu1 %v439_v4 }
   0xf   :  { %394 = vmatpush3.bf16.msra.mxu0 %v439_v4  ;;  %427 = vmatpush3.bf16.msra.mxu1 %v439_v4 }
  0x10   :  { %9 = vsyncpa [#allocation3], 0  ;;  %395 = vmatprep.subr.bf16.mxu0 %v440_v7  ;;  %421 = vmatprep.subr.bf16.mxu1 %v440_v7  ;;  %v441_v8 = vld [vmem:[%s600_s1 + $0x8] sm:$0xff]   ;;  %v442_v9 = vld [vmem:[%s600_s1] sm:$0xff]  }
  0x11   :  { %v445_v10 = vld [vmem:[%s599_s0 + $0x8] sm:$0xff]   ;;  %v447_v12 = vld [vmem:[%s599_s0 + $0x10] sm:$0xff]   ;;  %v449_v14 = vld [vmem:[%s599_s0 + $0x18] sm:$0xff]  }
  0x12   :  { %v446_v11 = vld [vmem:[%s599_s0 + $0x28] sm:$0xff]   ;;  %v448_v13 = vld [vmem:[%s599_s0 + $0x30] sm:$0xff]   ;;  %v450_v15 = vld [vmem:[%s599_s0 + $0x38] sm:$0xff]   ;;  %s473_s0 = smov [#allocation2]  }
  0x13   :  { %396 = vmatpush3.bf16.msra.mxu0 %v440_v7  ;;  %428 = vmatpush3.bf16.msra.mxu1 %v440_v7  ;;  %v557_v16 = vld [vmem:[%s601_s2] ss:$0 sm:$0xff]  ;;  %s336_s2 = sshll.u32 %s473_s0, 4  ;;  %s337_s2 = int_to_ptr.vmem [resolvable:$true] %s336_s2 }
  0x14   :  { %397 = vmatprep.subr.bf16.mxu0 %v441_v8  ;;  %422 = vmatprep.subr.bf16.mxu1 %v441_v8  ;;  %v562_v18 = vld [vmem:[%s602_s3] ss:$0 sm:$0xff]  ;;  %s451_s3 = scalar_lea.vmem %s337_s2, 2048  ;;  %p456_p1 = scmp.lt.s32.totalorder %s337_s2, %s337_s2 }
  0x15   :  { %p452_p0 = scmp.ne.s32.totalorder %s337_s2, %s451_s3  ;;  %p457_p2 = scmp.lt.s32.totalorder %s451_s3, %s451_s3 }
  0x17   :  { %398 = vmatpush3.bf16.msra.mxu0 %v441_v8  ;;  %429 = vmatpush3.bf16.msra.mxu1 %v441_v8  ;;  %p458_p3 = por %p457_p2, %p456_p1 }
  0x18   :  { %399 = vmatprep.subr.bf16.mxu0 %v442_v9  ;;  %423 = vmatprep.subr.bf16.mxu1 %v442_v9 }
  0x19   :  { %p459_p4 = pnand %p458_p3, %p452_p0 }
  0x1b   :  { %400 = vmatpush3.bf16.msra.mxu0 %v442_v9  ;;  %430 = vmatpush3.bf16.msra.mxu1 %v442_v9 }
  0x1e   :  { %402 = vmatmul.mubr.msk.bf16.vlgmr.msra.gmra.mxu0 %vm127_vm1, %v445_v10  ;;  %410 = vmatmul.mubr.msk.bf16.vlgmr.msra.gmra.mxu1 %vm127_vm1, %v446_v11 }
  0x1f   :  { %405 = vmatprep.mubr.msk.bf16.mxu0 %vm127_vm1, %v447_v12  ;;  %413 = vmatprep.mubr.msk.bf16.mxu1 %vm127_vm1, %v448_v13 }
  0x26   :  { %406 = vmatmul.mubr.msk.bf16.gmra.mxu0 %vm127_vm1, %v449_v14  ;;  %414 = vmatmul.mubr.msk.bf16.gmra.mxu1 %vm127_vm1, %v450_v15 }
  0xde   :  { %v403_v17 = vpop.f32.mrf.mxu0  ;;  %v411_v19 = vpop.f32.mrf.mxu1 }
  0xdf   :  { %v262_v20 = vmul.f32 %v403_v17, %v557_v16  ;;  %v270_v21 = vmul.f32 %v411_v19, %v557_v16 }
  0xe0   :  { %v190_v22 = vpop.f32.mrf.mxu0  ;;  %v222_v23 = vpop.f32.mrf.mxu1 }
  0xe1   :  { %v285_v24 = vadd.f32 %v562_v18, %v262_v20  ;;  %v293_v25 = vadd.f32 %v562_v18, %v270_v21  ;;  %v260_v26 = vmul.f32 %v557_v16, %v190_v22  ;;  %v268_v27 = vmul.f32 %v557_v16, %v222_v23 }
  0xe2   :  { %v404_v28 = vpop.f32.mrf.mxu0  ;;  %v412_v29 = vpop.f32.mrf.mxu1 }
  0xe3   :  { %v301_v30 = vmax.f32 %v285_v24, 0.0  ;;  %v309_v31 = vmax.f32 %v293_v25, 0.0  ;;  %v283_v32 = vadd.f32 %v562_v18, %v260_v26  ;;  %v291_v33 = vadd.f32 %v562_v18, %v268_v27 }
  0xe4   :  { %v263_v34 = vmul.f32 %v404_v28, %v557_v16  ;;  %v271_v35 = vmul.f32 %v412_v29, %v557_v16  ;;  %v193_v36 = vpop.f32.mrf.mxu0  ;;  %v225_v37 = vpop.f32.mrf.mxu1 }
  0xe5   :  { %317 = vst [vmem:[#allocation2 + $0x10] sm:$0xff] %v301_v30  ;;  %325 = vst [vmem:[#allocation2 + $0x50] sm:$0xff] %v309_v31  ;;  %v299_v38 = vmax.f32 %v283_v32, 0.0  ;;  %v307_v39 = vmax.f32 %v291_v33, 0.0  ;;  %v261_v40 = vmul.f32 %v557_v16, %v193_v36  ;;  %v269_v41 = vmul.f32 %v557_v16, %v225_v37 }
  0xe6   :  { %v286_v42 = vadd.f32 %v562_v18, %v263_v34  ;;  %v294_v43 = vadd.f32 %v562_v18, %v271_v35  ;;  %v407_v44 = vpop.f32.mrf.mxu0  ;;  %v415_v45 = vpop.f32.mrf.mxu1 }
  0xe7   :  { %315 = vst [vmem:[#allocation2] sm:$0xff] %v299_v38  ;;  %323 = vst [vmem:[#allocation2 + $0x40] sm:$0xff] %v307_v39  ;;  %v284_v46 = vadd.f32 %v562_v18, %v261_v40  ;;  %v292_v47 = vadd.f32 %v562_v18, %v269_v41  ;;  %v266_v48 = vmul.f32 %v407_v44, %v557_v16 }
  0xe8   :  { %v274_v49 = vmul.f32 %v415_v45, %v557_v16  ;;  %v302_v50 = vmax.f32 %v286_v42, 0.0  ;;  %v310_v51 = vmax.f32 %v294_v43, 0.0  ;;  %v206_v52 = vpop.f32.mrf.mxu0  ;;  %v238_v53 = vpop.f32.mrf.mxu1 }
  0xe9   :  { %v300_v54 = vmax.f32 %v284_v46, 0.0  ;;  %v308_v55 = vmax.f32 %v292_v47, 0.0  ;;  %v289_v56 = vadd.f32 %v562_v18, %v266_v48  ;;  %v264_v58 = vmul.f32 %v557_v16, %v206_v52 }
  0xea   :  { %v297_v57 = vadd.f32 %v562_v18, %v274_v49  ;;  %318 = vst [vmem:[#allocation2 + $0x18] sm:$0xff] %v302_v50  ;;  %326 = vst [vmem:[#allocation2 + $0x58] sm:$0xff] %v310_v51  ;;  %v272_v59 = vmul.f32 %v557_v16, %v238_v53  ;;  %v408_v60 = vpop.f32.mrf.mxu0  ;;  %v416_v61 = vpop.f32.mrf.mxu1 }
  0xeb   :  { %316 = vst [vmem:[#allocation2 + $0x8] sm:$0xff] %v300_v54  ;;  %324 = vst [vmem:[#allocation2 + $0x48] sm:$0xff] %v308_v55  ;;  %v305_v62 = vmax.f32 %v289_v56, 0.0  ;;  %v267_v0 = vmul.f32 %v408_v60, %v557_v16  ;;  %v275_v1 = vmul.f32 %v416_v61, %v557_v16  ;;  %v287_v2 = vadd.f32 %v562_v18, %v264_v58 }
  0xec   :  { %v313_v63 = vmax.f32 %v297_v57, 0.0  ;;  %v295_v3 = vadd.f32 %v562_v18, %v272_v59  ;;  %v209_v4 = vpop.f32.mrf.mxu0  ;;  %v241_v5 = vpop.f32.mrf.mxu1 }
  0xed   :  { %321 = vst [vmem:[#allocation2 + $0x30] sm:$0xff] %v305_v62  ;;  %v290_v6 = vadd.f32 %v562_v18, %v267_v0  ;;  %v298_v7 = vadd.f32 %v562_v18, %v275_v1  ;;  %v265_v8 = vmul.f32 %v557_v16, %v209_v4  ;;  %v273_v9 = vmul.f32 %v557_v16, %v241_v5 }
  0xee   :  { %329 = vst [vmem:[#allocation2 + $0x70] sm:$0xff] %v313_v63  ;;  %v303_v10 = vmax.f32 %v287_v2, 0.0  ;;  %v311_v11 = vmax.f32 %v295_v3, 0.0 }
  0xef   :  { %v306_v12 = vmax.f32 %v290_v6, 0.0  ;;  %v314_v13 = vmax.f32 %v298_v7, 0.0  ;;  %v288_v14 = vadd.f32 %v562_v18, %v265_v8  ;;  %v296_v15 = vadd.f32 %v562_v18, %v273_v9 }
  0xf0   :  { %319 = vst [vmem:[#allocation2 + $0x20] sm:$0xff] %v303_v10  ;;  %327 = vst [vmem:[#allocation2 + $0x60] sm:$0xff] %v311_v11 }
  0xf1   :  { %322 = vst [vmem:[#allocation2 + $0x38] sm:$0xff] %v306_v12  ;;  %330 = vst [vmem:[#allocation2 + $0x78] sm:$0xff] %v314_v13  ;;  %v304_v17 = vmax.f32 %v288_v14, 0.0  ;;  %v312_v19 = vmax.f32 %v296_v15, 0.0 }
  0xf3   :  { %320 = vst [vmem:[#allocation2 + $0x28] sm:$0xff] %v304_v17  ;;  %328 = vst [vmem:[#allocation2 + $0x68] sm:$0xff] %v312_v19 }
  0xf4   :  { %462 = shalt.err (!%p459_p4)
}
  0xf5   :  { %s474_s22 = smov 128   ;;  %s475_s23 = smov 8  }
  0xf6   :  { %342 = dma.vmem_to_hbm [thread:$0]  %s337_s2, 2048, %s603_s4, [#allocation3], %s474_s22, %s474_s22, %s475_s23  }
  0xf7   :  { %471 = dma.done.wait [#allocation3], 2048  }
  0xf8   :  { %472 = vsyncadd [#allocation3], 4294965248 }
  0xf9   :  { %346 = vsyncpa [#allocation3], 1 }

</bundles_post_ra>
